<compile_context>
chip_gen: v7x
topology: tpu7x:2x2x1
jax: 0.10.0
libtpu: 0.0.40
codegen_flags: <defaults>
</compile_context>

<pallas_src>
import functools

import jax
import jax.numpy as jnp
from jax.experimental import pallas as pl
from jax.experimental.pallas import tpu as pltpu


def _round_up(n, m):
    return ((n + m - 1) // m) * m


def ae_kernel(x_ref,
              w1_ref, b1_ref,
              w2_ref, b2_ref,
              w3_ref, b3_ref,
              w4_ref, b4_ref,
              recon_ref, code_ref):
    """Whole AE forward for one batch tile: 4 bf16 matmuls (f32 acc) + f32 bias/ReLU."""
    bf16 = jnp.bfloat16
    x = x_ref[...].astype(bf16)                                  # cast fused in-kernel

    h1 = jnp.dot(x, w1_ref[...], preferred_element_type=jnp.float32) + b1_ref[...]
    h1 = jnp.maximum(h1, 0.0)                                    # f32

    code = jnp.dot(h1.astype(bf16), w2_ref[...],
                   preferred_element_type=jnp.float32) + b2_ref[...]
    code = jnp.maximum(code, 0.0)                                # f32, natural width H2

    h2 = jnp.dot(code.astype(bf16), w3_ref[...],
                 preferred_element_type=jnp.float32) + b3_ref[...]
    h2 = jnp.maximum(h2, 0.0)                                    # f32

    recon = jnp.dot(h2.astype(bf16), w4_ref[...],
                    preferred_element_type=jnp.float32) + b4_ref[...]
    recon = jnp.maximum(recon, 0.0)                              # f32, natural width D_in

    recon_ref[...] = recon.astype(recon_ref.dtype)
    code_ref[...] = code.astype(code_ref.dtype)


def _choose_tile(B, batch_tile):
    """Batch tile: multiple of 8 (sublane), aiming for ~8 grid steps when auto."""
    if batch_tile is None:
        tile = pl.cdiv(B, 8)                  # ~8 grid steps
        tile = max(8, min(1024, tile))        # clamp: amortize step overhead, fit VMEM
        tile = _round_up(tile, 8)
    else:
        tile = _round_up(min(int(batch_tile), B), 8)
    return tile


@functools.partial(jax.jit, static_argnames=("batch_tile",))
def ae_forward(x, prepared, batch_tile=None):
    """x: [B, D_in] float32.  prepared: output of prepare_params() (bf16 W, f32 b)."""
    B, D_in = x.shape
    w1, b1 = prepared["w1"], prepared["b1"]   # [D_in, H1], [1, H1]
    w2, b2 = prepared["w2"], prepared["b2"]   # [H1, H2],  [1, H2]
    w3, b3 = prepared["w3"], prepared["b3"]   # [H2, H1],  [1, H1]
    w4, b4 = prepared["w4"], prepared["b4"]   # [H1, D_in],[1, D_in]
    H1 = w1.shape[1]
    H2 = w2.shape[1]

    tile = _choose_tile(B, batch_tile)
    B_pad = _round_up(B, tile)

    # Only the batch dim is ever padded (and only when the tile doesn't divide B).
    x_in = x if B_pad == B else jnp.pad(x, ((0, B_pad - B), (0, 0)))

    grid = (B_pad // tile,)

    # Weights/biases: full blocks with a constant index_map -> fetched once,
    # stay VMEM-resident across all batch tiles.
    full = lambda a: pl.BlockSpec(a.shape, lambda i: (0, 0))

    recon_p, code_p = pl.pallas_call(
        ae_kernel,
        out_shape=(
            jax.ShapeDtypeStruct((B_pad, D_in), x.dtype),
            jax.ShapeDtypeStruct((B_pad, H2), x.dtype),
        ),
        grid_spec=pl.GridSpec(
            grid=grid,
            in_specs=[
                pl.BlockSpec((tile, D_in), lambda i: (i, 0)),    # x (f32, natural width)
                full(w1), full(b1),
                full(w2), full(b2),
                full(w3), full(b3),
                full(w4), full(b4),
            ],
            out_specs=[
                pl.BlockSpec((tile, D_in), lambda i: (i, 0)),    # reconstructed
                pl.BlockSpec((tile, H2), lambda i: (i, 0)),      # code
            ],
        ),
        compiler_params=pltpu.CompilerParams(
            dimension_semantics=("parallel",),        # megacore-shards batch tiles
            vmem_limit_bytes=32 * 1024 * 1024,        # ample for tile<=1024 at these dims,
                                                      # and <=48 MiB budget on v7x
        ),
    )(x_in, w1, b1, w2, b2, w3, b3, w4, b4)

    if B_pad == B:
        return recon_p, code_p
    return recon_p[:B], code_p[:B]


def prepare_params(params):
    """One-time prep (do NOT call per forward): bf16 weights, f32 [1,out] biases."""
    out = {}
    for i in (1, 2, 3, 4):
        w = jnp.asarray(params[f"w{i}"], jnp.bfloat16)
        b = jnp.asarray(params[f"b{i}"], jnp.float32).reshape(1, -1)
        out[f"w{i}"] = w
        out[f"b{i}"] = b
    return out


def init_params(key, d_in, h1=64, h2=8, dtype=jnp.float32):
    """Deterministic init mirroring nn.Linear's U(-1/sqrt(fan_in), 1/sqrt(fan_in)).
    Weights stored as [in, out] (i.e. the transpose of PyTorch's [out, in])."""
    keys = jax.random.split(key, 8)

    def linear(kw, kb, fan_in, fan_out):
        bound = 1.0 / jnp.sqrt(jnp.asarray(fan_in, dtype))
        w = jax.random.uniform(kw, (fan_in, fan_out), dtype, -bound, bound)
        b = jax.random.uniform(kb, (1, fan_out), dtype, -bound, bound)
        return w, b

    w1, b1 = linear(keys[0], keys[1], d_in, h1)
    w2, b2 = linear(keys[2], keys[3], h1, h2)
    w3, b3 = linear(keys[4], keys[5], h2, h1)
    w4, b4 = linear(keys[6], keys[7], h1, d_in)
    return {"w1": w1, "b1": b1, "w2": w2, "b2": b2,
            "w3": w3, "b3": b3, "w4": w4, "b4": b4}


def ae_forward_ref(x, p):
    """Pure-JAX reference with the same bf16-matmul / f32-accumulate recipe.
    (bf16 weights are a documented, deliberate deviation from f32 PyTorch.)"""
    bf16 = jnp.bfloat16

    def layer(a, w, b):
        y = jnp.dot(a.astype(bf16), w.astype(bf16),
                    preferred_element_type=jnp.float32) + b.astype(jnp.float32)
        return jnp.maximum(y, 0.0)

    h1 = layer(x, p["w1"], p["b1"])
    code = layer(h1, p["w2"], p["b2"])
    h2 = layer(code, p["w3"], p["b3"])
    recon = layer(h2, p["w4"], p["b4"])
    return recon.astype(x.dtype), code.astype(x.dtype)


if __name__ == "__main__":
    key = jax.random.PRNGKey(0)
    k_x, k_p = jax.random.split(key)

    B, D_IN, H1, H2 = 512, 32, 64, 8
    x = jax.random.normal(k_x, (B, D_IN), jnp.float32)
    params = init_params(k_p, D_IN, H1, H2)

    # One-time weight prep outside the forward path (weights are static for inference).
    prepared = prepare_params(params)

    # Auto tile -> tile=64, grid of 8 steps (several per TensorCore on v7x).
    recon, code = ae_forward(x, prepared)
    jax.block_until_ready((recon, code))

    recon_ref, code_ref = ae_forward_ref(x, params)
    assert recon.shape == (B, D_IN) and code.shape == (B, H2)
    assert jnp.allclose(recon, recon_ref, atol=1e-3, rtol=1e-3)
    assert jnp.allclose(code, code_ref, atol=1e-3, rtol=1e-3)

    # Also exercise a non-dividing user tile (rounded to a multiple of 8) + batch padding.
    recon2, code2 = ae_forward(x[:100], prepared, batch_tile=40)
    jax.block_until_ready((recon2, code2))
    assert jnp.allclose(recon2, recon_ref[:100], atol=1e-3, rtol=1e-3)
    assert jnp.allclose(code2, code_ref[:100], atol=1e-3, rtol=1e-3)

    print("KERNEL_OK")
</pallas_src>

<mosaic_0001>
module attributes {stable_mosaic.version = 11 : i64} {
  func.func @ae_kernel(%arg0: i32, %arg1: memref<64x32xf32, #tpu.memory_space<vmem>>, %arg2: memref<32x64xbf16, #tpu.memory_space<vmem>>, %arg3: memref<1x64xf32, #tpu.memory_space<vmem>>, %arg4: memref<64x8xbf16, #tpu.memory_space<vmem>>, %arg5: memref<1x8xf32, #tpu.memory_space<vmem>>, %arg6: memref<8x64xbf16, #tpu.memory_space<vmem>>, %arg7: memref<1x64xf32, #tpu.memory_space<vmem>>, %arg8: memref<64x32xbf16, #tpu.memory_space<vmem>>, %arg9: memref<1x32xf32, #tpu.memory_space<vmem>>, %arg10: memref<64x32xf32, #tpu.memory_space<vmem>>, %arg11: memref<64x8xf32, #tpu.memory_space<vmem>>) attributes {dimension_semantics = [#tpu.dimension_semantics<parallel>], iteration_bounds = array<i64: 8>, scalar_prefetch = 0 : i64, scratch_operands = 0 : i64, tpu.core_type = #tpu.core_type<tc>, window_params = [{transform_indices = @transform_0, window_bounds = array<i64: 64, 32>}, {pipeline_mode = #tpu.pipeline_mode<synchronous>, transform_indices = @transform_1, window_bounds = array<i64: 32, 64>}, {pipeline_mode = #tpu.pipeline_mode<synchronous>, transform_indices = @transform_2, window_bounds = array<i64: 1, 64>}, {pipeline_mode = #tpu.pipeline_mode<synchronous>, transform_indices = @transform_3, window_bounds = array<i64: 64, 8>}, {pipeline_mode = #tpu.pipeline_mode<synchronous>, transform_indices = @transform_4, window_bounds = array<i64: 1, 8>}, {pipeline_mode = #tpu.pipeline_mode<synchronous>, transform_indices = @transform_5, window_bounds = array<i64: 8, 64>}, {pipeline_mode = #tpu.pipeline_mode<synchronous>, transform_indices = @transform_6, window_bounds = array<i64: 1, 64>}, {pipeline_mode = #tpu.pipeline_mode<synchronous>, transform_indices = @transform_7, window_bounds = array<i64: 64, 32>}, {pipeline_mode = #tpu.pipeline_mode<synchronous>, transform_indices = @transform_8, window_bounds = array<i64: 1, 32>}, {transform_indices = @transform_9, window_bounds = array<i64: 64, 32>}, {transform_indices = @transform_10, window_bounds = array<i64: 64, 8>}]} {
    %c0 = arith.constant 0 : index
    %c0_0 = arith.constant 0 : index
    %0 = vector.load %arg1[%c0, %c0_0] : memref<64x32xf32, #tpu.memory_space<vmem>>, vector<64x32xf32>
    %1 = arith.truncf %0 : vector<64x32xf32> to vector<64x32xbf16>
    %c0_1 = arith.constant 0 : index
    %c0_2 = arith.constant 0 : index
    %2 = vector.load %arg2[%c0_1, %c0_2] : memref<32x64xbf16, #tpu.memory_space<vmem>>, vector<32x64xbf16>
    %cst = arith.constant dense<0.000000e+00> : vector<64x64xf32>
    %3 = tpu.matmul %1, %2, %cst {dimension_numbers = #tpu.dot_dimension_numbers<[1], [0], [0], [1], [0, 0, 1, 1], [], []>} : vector<64x32xbf16>, vector<32x64xbf16>, vector<64x64xf32> -> vector<64x64xf32>
    %c0_3 = arith.constant 0 : index
    %c0_4 = arith.constant 0 : index
    %4 = vector.load %arg3[%c0_3, %c0_4] : memref<1x64xf32, #tpu.memory_space<vmem>>, vector<1x64xf32>
    %5 = vector.broadcast %4 : vector<1x64xf32> to vector<64x64xf32>
    %6 = arith.addf %3, %5 : vector<64x64xf32>
    %cst_5 = arith.constant 0.000000e+00 : f32
    %7 = vector.broadcast %cst_5 : f32 to vector<64x64xf32>
    %8 = arith.maximumf %6, %7 : vector<64x64xf32>
    %9 = arith.truncf %8 : vector<64x64xf32> to vector<64x64xbf16>
    %c0_6 = arith.constant 0 : index
    %c0_7 = arith.constant 0 : index
    %10 = vector.load %arg4[%c0_6, %c0_7] : memref<64x8xbf16, #tpu.memory_space<vmem>>, vector<64x8xbf16>
    %cst_8 = arith.constant dense<0.000000e+00> : vector<64x8xf32>
    %11 = tpu.matmul %9, %10, %cst_8 {dimension_numbers = #tpu.dot_dimension_numbers<[1], [0], [0], [1], [0, 0, 1, 1], [], []>} : vector<64x64xbf16>, vector<64x8xbf16>, vector<64x8xf32> -> vector<64x8xf32>
    %c0_9 = arith.constant 0 : index
    %c0_10 = arith.constant 0 : index
    %12 = vector.load %arg5[%c0_9, %c0_10] : memref<1x8xf32, #tpu.memory_space<vmem>>, vector<1x8xf32>
    %13 = vector.broadcast %12 : vector<1x8xf32> to vector<64x8xf32>
    %14 = arith.addf %11, %13 : vector<64x8xf32>
    %cst_11 = arith.constant 0.000000e+00 : f32
    %15 = vector.broadcast %cst_11 : f32 to vector<64x8xf32>
    %16 = arith.maximumf %14, %15 : vector<64x8xf32>
    %17 = arith.truncf %16 : vector<64x8xf32> to vector<64x8xbf16>
    %c0_12 = arith.constant 0 : index
    %c0_13 = arith.constant 0 : index
    %18 = vector.load %arg6[%c0_12, %c0_13] : memref<8x64xbf16, #tpu.memory_space<vmem>>, vector<8x64xbf16>
    %cst_14 = arith.constant dense<0.000000e+00> : vector<64x64xf32>
    %19 = tpu.matmul %17, %18, %cst_14 {dimension_numbers = #tpu.dot_dimension_numbers<[1], [0], [0], [1], [0, 0, 1, 1], [], []>} : vector<64x8xbf16>, vector<8x64xbf16>, vector<64x64xf32> -> vector<64x64xf32>
    %c0_15 = arith.constant 0 : index
    %c0_16 = arith.constant 0 : index
    %20 = vector.load %arg7[%c0_15, %c0_16] : memref<1x64xf32, #tpu.memory_space<vmem>>, vector<1x64xf32>
    %21 = vector.broadcast %20 : vector<1x64xf32> to vector<64x64xf32>
    %22 = arith.addf %19, %21 : vector<64x64xf32>
    %cst_17 = arith.constant 0.000000e+00 : f32
    %23 = vector.broadcast %cst_17 : f32 to vector<64x64xf32>
    %24 = arith.maximumf %22, %23 : vector<64x64xf32>
    %25 = arith.truncf %24 : vector<64x64xf32> to vector<64x64xbf16>
    %c0_18 = arith.constant 0 : index
    %c0_19 = arith.constant 0 : index
    %26 = vector.load %arg8[%c0_18, %c0_19] : memref<64x32xbf16, #tpu.memory_space<vmem>>, vector<64x32xbf16>
    %cst_20 = arith.constant dense<0.000000e+00> : vector<64x32xf32>
    %27 = tpu.matmul %25, %26, %cst_20 {dimension_numbers = #tpu.dot_dimension_numbers<[1], [0], [0], [1], [0, 0, 1, 1], [], []>} : vector<64x64xbf16>, vector<64x32xbf16>, vector<64x32xf32> -> vector<64x32xf32>
    %c0_21 = arith.constant 0 : index
    %c0_22 = arith.constant 0 : index
    %28 = vector.load %arg9[%c0_21, %c0_22] : memref<1x32xf32, #tpu.memory_space<vmem>>, vector<1x32xf32>
    %29 = vector.broadcast %28 : vector<1x32xf32> to vector<64x32xf32>
    %30 = arith.addf %27, %29 : vector<64x32xf32>
    %cst_23 = arith.constant 0.000000e+00 : f32
    %31 = vector.broadcast %cst_23 : f32 to vector<64x32xf32>
    %32 = arith.maximumf %30, %31 : vector<64x32xf32>
    %c0_24 = arith.constant 0 : index
    %c0_25 = arith.constant 0 : index
    %33 = vector.load %arg10[%c0_24, %c0_25] : memref<64x32xf32, #tpu.memory_space<vmem>>, vector<64x32xf32>
    tpu.vector_store %arg10[%c0_24, %c0_25], %32 {strides = array<i32>} : memref<64x32xf32, #tpu.memory_space<vmem>>, vector<64x32xf32>,
    %c0_26 = arith.constant 0 : index
    %c0_27 = arith.constant 0 : index
    %34 = vector.load %arg11[%c0_26, %c0_27] : memref<64x8xf32, #tpu.memory_space<vmem>>, vector<64x8xf32>
    tpu.vector_store %arg11[%c0_26, %c0_27], %16 {strides = array<i32>} : memref<64x8xf32, #tpu.memory_space<vmem>>, vector<64x8xf32>,
    return
  }
  func.func @transform_0(%arg0: i32) -> (i32, i32) {
    %c0_i32 = arith.constant 0 : i32
    %c0_i32_0 = arith.constant 0 : i32
    return %arg0, %c0_i32 : i32, i32
  }
  func.func @transform_1(%arg0: i32) -> (i32, i32) {
    %c0_i32 = arith.constant 0 : i32
    %c0_i32_0 = arith.constant 0 : i32
    %c0_i32_1 = arith.constant 0 : i32
    return %c0_i32, %c0_i32_0 : i32, i32
  }
  func.func @transform_2(%arg0: i32) -> (i32, i32) {
    %c0_i32 = arith.constant 0 : i32
    %c0_i32_0 = arith.constant 0 : i32
    %c0_i32_1 = arith.constant 0 : i32
    return %c0_i32, %c0_i32_0 : i32, i32
  }
  func.func @transform_3(%arg0: i32) -> (i32, i32) {
    %c0_i32 = arith.constant 0 : i32
    %c0_i32_0 = arith.constant 0 : i32
    %c0_i32_1 = arith.constant 0 : i32
    return %c0_i32, %c0_i32_0 : i32, i32
  }
  func.func @transform_4(%arg0: i32) -> (i32, i32) {
    %c0_i32 = arith.constant 0 : i32
    %c0_i32_0 = arith.constant 0 : i32
    %c0_i32_1 = arith.constant 0 : i32
    return %c0_i32, %c0_i32_0 : i32, i32
  }
  func.func @transform_5(%arg0: i32) -> (i32, i32) {
    %c0_i32 = arith.constant 0 : i32
    %c0_i32_0 = arith.constant 0 : i32
    %c0_i32_1 = arith.constant 0 : i32
    return %c0_i32, %c0_i32_0 : i32, i32
  }
  func.func @transform_6(%arg0: i32) -> (i32, i32) {
    %c0_i32 = arith.constant 0 : i32
    %c0_i32_0 = arith.constant 0 : i32
    %c0_i32_1 = arith.constant 0 : i32
    return %c0_i32, %c0_i32_0 : i32, i32
  }
  func.func @transform_7(%arg0: i32) -> (i32, i32) {
    %c0_i32 = arith.constant 0 : i32
    %c0_i32_0 = arith.constant 0 : i32
    %c0_i32_1 = arith.constant 0 : i32
    return %c0_i32, %c0_i32_0 : i32, i32
  }
  func.func @transform_8(%arg0: i32) -> (i32, i32) {
    %c0_i32 = arith.constant 0 : i32
    %c0_i32_0 = arith.constant 0 : i32
    %c0_i32_1 = arith.constant 0 : i32
    return %c0_i32, %c0_i32_0 : i32, i32
  }
  func.func @transform_9(%arg0: i32) -> (i32, i32) {
    %c0_i32 = arith.constant 0 : i32
    %c0_i32_0 = arith.constant 0 : i32
    return %arg0, %c0_i32 : i32, i32
  }
  func.func @transform_10(%arg0: i32) -> (i32, i32) {
    %c0_i32 = arith.constant 0 : i32
    %c0_i32_0 = arith.constant 0 : i32
    return %arg0, %c0_i32 : i32, i32
  }
}

</mosaic_0001>

<bundles_post_ra>
// kernel: ae_forward.1
= control target key start
LH: loop header
LB: loop body
LE: loop exit
PB: predicated region body
PF: predicated region fallthrough
CT: control target
= control target key end

     0   :  { %s1170_s13 = smov 0   ;;  %s1282_s0 = inlined_call_operand.vmem [shape: f32[512,32], index: 0, kind: input, shape index: {}]   ;;  %s1283_s1 = inlined_call_operand.vmem [shape: bf16[32,64], index: 1, kind: input, shape index: {}]   ;;  %s1284_s2 = inlined_call_operand.vmem [shape: f32[1,64], index: 2, kind: input, shape index: {}]   ;;  %s1285_s3 = inlined_call_operand.vmem [shape: bf16[64,8], index: 3, kind: input, shape index: {}]   ;;  %s1286_s4 = inlined_call_operand.vmem [shape: f32[1,8], index: 4, kind: input, shape index: {}]   ;;  %s1287_s5 = inlined_call_operand.vmem [shape: bf16[8,64], index: 5, kind: input, shape index: {}]   ;;  %s1288_s6 = inlined_call_operand.vmem [shape: f32[1,64], index: 6, kind: input, shape index: {}]   ;;  %s1289_s7 = inlined_call_operand.vmem [shape: bf16[64,32], index: 7, kind: input, shape index: {}]   ;;  %s1290_s8 = inlined_call_operand.vmem [shape: f32[1,32], index: 8, kind: input, shape index: {}]   ;;  %s1291_s9 = inlined_call_operand.vmem [shape: f32[512,32], index: 9, kind: output, shape index: {0}]   ;;  %s1292_s10 = inlined_call_operand.vmem [shape: f32[512,8], index: 10, kind: output, shape index: {1}]  }
   0x1 LB: > { %s964_s14 = sadd.s32 4294967295, %s1113_s13   ;;  %p968_p0 = scmp.ge.s32.totalorder %s1113_s13, 1  ;;  %s1113_s13 = sphi %s1170_s13, %s21_s13  }
   0x2   : > { %p316_p1 = scmp.lt.s32.totalorder %s1113_s13, 9 }
   0x4   : > { %p317_p2 = pnand %p968_p0, %p316_p1 }
   0x5   : > { %v1097_v0 = vld [vmem:[%s1283_s1] sm:$0xff] (!%p317_p2)   ;;  %s969_s17 = sshll.u32 (!%p317_p2), %s964_s14, 3  ;;  %v1098_v1 = vld [vmem:[%s1283_s1 + $0x8] sm:$0xff] (!%p317_p2)   ;;  %vm413_vm0 = vcmask (!%p317_p2), 261120   ;;  %v1101_v16 = vld [vmem:[%s1285_s3 + $0x10] sm:$0xff] (!%p317_p2)   ;;  %vm653_vm1 = vcmask (!%p317_p2), 1043456  }
   0x6   : > { %320 = sbr.rel (%p317_p2) target bundleno = 914 (0x392), region = 56  ;;  %p360_p3 = scmp.lt.s32.totalorder (!%p317_p2), %s969_s17, 63  ;;  %1034 = vmatprep.subr.bf16.mxu0 (!%p317_p2), %v1097_v0  ;;  %v1099_v2 = vld [vmem:[%s1285_s3] sm:$0xff] (!%p317_p2)   ;;  %v1100_v3 = vld [vmem:[%s1285_s3 + $0x8] sm:$0xff] (!%p317_p2)   ;;  %v1102_v17 = vld [vmem:[%s1285_s3 + $0x18] sm:$0xff] (!%p317_p2)   ;;  %vm542_vm2 = vcmask (!%p317_p2), 523264  }
   0x7   : > { %1035 = vmatpush3.bf16.msra.mxu0 (!%p317_p2), %v1097_v0  ;;  %1046 = vmatprep.subr.bf16.mxu1 (!%p317_p2), %v1099_v2  ;;  %v632_v18 = vld [vmem:[%s1287_s5] sm:$0xf] (!%p317_p2)  ;;  %v1104_v50 = vld [vmem:[%s1289_s7 + $0x8] sm:$0xff] (!%p317_p2)   ;;  %vm640_vm3 = vcmask (!%p317_p2), 64512  }
   0x8   : > { %1036 = vmatprep.subr.bf16.mxu0 (!%p317_p2), %v1098_v1  ;;  %1047 = vmatpush3.bf16.msra.mxu1 (!%p317_p2), %v1099_v2  ;;  %v655_v19 = vsel (!%p317_p2), %vm653_vm1, %v632_v18, 0  ;;  %v975_v20 = vld [vmem:[%s1284_s2] ss:$0 sm:$0xff] (!%p317_p2) }
   0x9   : > { %1048 = vmatprep.subr.bf16.mxu1 (!%p317_p2), %v1100_v3  ;;  %v1103_v49 = vld [vmem:[%s1289_s7] sm:$0xff] (!%p317_p2)  }
   0xa   : > { %v982_v51 = vld [vmem:[%s1286_s4] ss:$0 sm:$0xff] (!%p317_p2) }
   0xb   : > { %1037 = vmatpush3.bf16.msra.mxu0 (!%p317_p2), %v1098_v1 }
   0xc   : > { %1049 = vmatpush3.bf16.msra.mxu1 (!%p317_p2), %v1100_v3  ;;  %1088 = vmatprep.subr.msk.bf16.mxu0 (!%p317_p2), %vm653_vm1, %v632_v18  ;;  %v991_v18 = vld [vmem:[%s1288_s6] ss:$0 sm:$0xff] (!%p317_p2) }
   0xd   : > { %s1294_s17 = smov (!%p360_p3, %s969_s17), 63  ;;  %1050 = vmatprep.subr.bf16.mxu1 %v1101_v16 }
   0xe   : > { %s1190_s24 = sshll.u32 %s1294_s17, 3 }
   0xf   : > { %s363_s27 = scalar_lea.vmem %s1282_s0, %s1190_s24  ;;  %s1229_s26 = scalar_lea.vmem %s1292_s10, %s1190_s24 }
  0x10   : > { %v378_v4 = vld [vmem:[%s363_s27] sm:$0xff]  ;;  %v379_v5 = vld [vmem:[%s363_s27 + $0x8] sm:$0xff]  ;;  %v380_v6 = vld [vmem:[%s363_s27 + $0x10] sm:$0xff]  ;;  %1051 = vmatpush3.bf16.msra.mxu1 %v1101_v16  ;;  %s369_s18 = scalar_lea.vmem %s1291_s9, %s1190_s24 }
  0x11   : > { %v386_v7 = vpack.c.bf16 %v379_v5, %v378_v4  ;;  %v381_v8 = vld [vmem:[%s363_s27 + $0x18] sm:$0xff]  ;;  %v382_v9 = vld [vmem:[%s363_s27 + $0x20] sm:$0xff]  ;;  %v383_v10 = vld [vmem:[%s363_s27 + $0x28] sm:$0xff]  ;;  %1052 = vmatprep.subr.bf16.mxu1 %v1102_v17 }
  0x12   : > { %v387_v11 = vpack.c.bf16 %v381_v8, %v380_v6  ;;  %v388_v12 = vpack.c.bf16 %v383_v10, %v382_v9  ;;  %v384_v13 = vld [vmem:[%s363_s27 + $0x30] sm:$0xff]  ;;  %v385_v14 = vld [vmem:[%s363_s27 + $0x38] sm:$0xff] }
  0x13   : > { %1038 = vmatprep.mubr.msk.bf16.mxu0 %vm413_vm0, %v386_v7  ;;  %v389_v15 = vpack.c.bf16 %v385_v14, %v384_v13  ;;  %v1105_v16 = vld [vmem:[%s1289_s7 + $0x10] sm:$0xff]  }
  0x14   : > { %1039 = vmatmul.mubr.msk.bf16.vlgmr.msra.gmra.mrb[0].mxu0 %vm413_vm0, %v387_v11  ;;  %1053 = vmatpush3.bf16.msra.mxu1 %v1102_v17  ;;  %v1106_v17 = vld [vmem:[%s1289_s7 + $0x18] sm:$0xff]  }
  0x15   : > { %1042 = vmatprep.mubr.msk.bf16.mxu0 %vm413_vm0, %v388_v12  ;;  %1063 = vmatpush3.bf16.msra.mxu0 %v655_v19 }
  0x16   : > { %1072 = vmatprep.subr.bf16.mxu1 %v1103_v49 }
  0x1c   : > { %1043 = vmatmul.mubr.msk.bf16.gmra.mrb[4].mxu0 %vm413_vm0, %v389_v15 }
  0xe7   : > { %v1040_v21 = vpop.f32.mrb[0].mxu0 }
  0xe8   : > { %v469_v22 = vadd.f32 %v1040_v21, %v975_v20  ;;  %v460_v23 = vpop.f32.mrb[1].mxu0 }
  0xe9   : > { %v461_v24 = vadd.f32 %v975_v20, %v460_v23  ;;  %v1041_v25 = vpop.f32.mrb[2].mxu0 }
  0xea   : > { %v472_v26 = vadd.f32 %v1041_v25, %v975_v20  ;;  %v463_v27 = vpop.f32.mrb[3].mxu0  ;;  %v493_v29 = vmax.f32 %v469_v22, 0.0 }
  0xeb   : > { %v464_v28 = vadd.f32 %v975_v20, %v463_v27  ;;  %v491_v31 = vmax.f32 %v461_v24, 0.0 }
  0xec   : > { %v494_v30 = vmax.f32 %v472_v26, 0.0 }
  0xed   : > { %v492_v32 = vmax.f32 %v464_v28, 0.0 }
  0xee   : > { %v500_v33 = vpack.c.bf16 %v494_v30, %v493_v29 }
  0xef   : > { %v1044_v34 = vpop.f32.mrb[4].mxu0  ;;  %v499_v35 = vpack.c.bf16 %v492_v32, %v491_v31 }
  0xf0   : > { %v485_v36 = vadd.f32 %v1044_v34, %v975_v20  ;;  %v476_v37 = vpop.f32.mrb[5].mxu0 }
  0xf1   : > { %v477_v38 = vadd.f32 %v975_v20, %v476_v37  ;;  %v1045_v39 = vpop.f32.mrb[6].mxu0  ;;  %1054 = vmatprep.mubr.msk.bf16.mxu1 %vm542_vm2, %v499_v35 }
  0xf2   : > { %v488_v40 = vadd.f32 %v1045_v39, %v975_v20  ;;  %v479_v41 = vpop.f32.mrb[7].mxu0  ;;  %1055 = vmatmul.mubr.msk.bf16.vlgmr.msra.gmra.mrb[0].mxu1 %vm542_vm2, %v500_v33  ;;  %v497_v43 = vmax.f32 %v485_v36, 0.0 }
  0xf3   : > { %v480_v42 = vadd.f32 %v975_v20, %v479_v41  ;;  %v495_v45 = vmax.f32 %v477_v38, 0.0  ;;  %1073 = vmatpush3.bf16.msra.mxu1 %v1103_v49 }
  0xf4   : > { %v498_v44 = vmax.f32 %v488_v40, 0.0  ;;  %1074 = vmatprep.subr.bf16.mxu1 %v1104_v50 }
  0xf5   : > { %v496_v46 = vmax.f32 %v480_v42, 0.0 }
  0xf6   : > { %v502_v47 = vpack.c.bf16 %v498_v44, %v497_v43 }
  0xf7   : > { %v501_v48 = vpack.c.bf16 %v496_v46, %v495_v45  ;;  %1075 = vmatpush3.bf16.msra.mxu1 %v1104_v50 }
  0xf8   : > { %1076 = vmatprep.subr.bf16.mxu1 %v1105_v16 }
  0xf9   : > { %1058 = vmatprep.mubr.msk.bf16.mxu1 %vm542_vm2, %v501_v48 }
  0xfa   : > { %1059 = vmatmul.mubr.msk.bf16.gmra.mrb[4].mxu1 %vm542_vm2, %v502_v47  ;;  %v996_v47 = vld [vmem:[%s1290_s8] ss:$0 sm:$0xff] }
  0xfb   : > { %1077 = vmatpush3.bf16.msra.mxu1 %v1105_v16 }
  0xfc   : > { %1078 = vmatprep.subr.bf16.mxu1 %v1106_v17 }
  0xff   : > { %1079 = vmatpush3.bf16.msra.mxu1 %v1106_v17 }
 0x1c5   : > { %v1056_v52 = vpop.f32.mrb[0].mxu1 }
 0x1c6   : > { %v598_v53 = vadd.f32 %v1056_v52, %v982_v51  ;;  %v589_v54 = vpop.f32.mrb[1].mxu1 }
 0x1c7   : > { %v590_v55 = vadd.f32 %v982_v51, %v589_v54  ;;  %v1057_v56 = vpop.f32.mrb[2].mxu1 }
 0x1c8   : > { %v622_v57 = vmax.f32 %v598_v53, 0.0  ;;  %v601_v58 = vadd.f32 %v1057_v56, %v982_v51  ;;  %v592_v59 = vpop.f32.mrb[3].mxu1 }
 0x1c9   : > { %v620_v60 = vmax.f32 %v590_v55, 0.0  ;;  %v593_v61 = vadd.f32 %v982_v51, %v592_v59 }
 0x1ca   : > { %868 = vst.msk [vmem:[%s1229_s26 + $0x10] sm:$0xff] %vm640_vm3, %v622_v57  ;;  %v623_v62 = vmax.f32 %v601_v58, 0.0 }
 0x1cb   : > { %866 = vst.msk [vmem:[%s1229_s26] sm:$0xff] %vm640_vm3, %v620_v60  ;;  %v621_v63 = vmax.f32 %v593_v61, 0.0 }
 0x1cc   : > { %v629_v0 = vpack.c.bf16 %v623_v62, %v622_v57  ;;  %869 = vst.msk [vmem:[%s1229_s26 + $0x18] sm:$0xff] %vm640_vm3, %v623_v62 }
 0x1cd   : > { %v628_v1 = vpack.c.bf16 %v621_v63, %v620_v60  ;;  %867 = vst.msk [vmem:[%s1229_s26 + $0x8] sm:$0xff] %vm640_vm3, %v621_v63  ;;  %v1060_v2 = vpop.f32.mrb[4].mxu1 }
 0x1ce   : > { %v614_v3 = vadd.f32 %v1060_v2, %v982_v51  ;;  %v605_v4 = vpop.f32.mrb[5].mxu1 }
 0x1cf   : > { %v606_v5 = vadd.f32 %v982_v51, %v605_v4  ;;  %v1061_v6 = vpop.f32.mrb[6].mxu1  ;;  %1064 = vmatprep.mubr.msk.bf16.mxu0 %vm640_vm3, %v628_v1 }
 0x1d0   : > { %v626_v7 = vmax.f32 %v614_v3, 0.0  ;;  %v617_v8 = vadd.f32 %v1061_v6, %v982_v51  ;;  %v608_v9 = vpop.f32.mrb[7].mxu1  ;;  %1065 = vmatmul.mubr.msk.bf16.vlgmr.msra.gmra.mrb[8].mxu0 %vm640_vm3, %v629_v0 }
 0x1d1   : > { %v624_v10 = vmax.f32 %v606_v5, 0.0  ;;  %v609_v11 = vadd.f32 %v982_v51, %v608_v9 }
 0x1d2   : > { %872 = vst.msk [vmem:[%s1229_s26 + $0x30] sm:$0xff] %vm640_vm3, %v626_v7  ;;  %v627_v12 = vmax.f32 %v617_v8, 0.0 }
 0x1d3   : > { %870 = vst.msk [vmem:[%s1229_s26 + $0x20] sm:$0xff] %vm640_vm3, %v624_v10  ;;  %v625_v13 = vmax.f32 %v609_v11, 0.0 }
 0x1d4   : > { %v631_v14 = vpack.c.bf16 %v627_v12, %v626_v7  ;;  %873 = vst.msk [vmem:[%s1229_s26 + $0x38] sm:$0xff] %vm640_vm3, %v627_v12 }
 0x1d5   : > { %v630_v15 = vpack.c.bf16 %v625_v13, %v624_v10  ;;  %871 = vst.msk [vmem:[%s1229_s26 + $0x28] sm:$0xff] %vm640_vm3, %v625_v13 }
 0x1d7   : > { %1068 = vmatprep.mubr.msk.bf16.mxu0 %vm640_vm3, %v630_v15 }
 0x1d8   : > { %1069 = vmatmul.mubr.msk.bf16.gmra.mrb[12].mxu0 %vm640_vm3, %v631_v14 }
 0x2a3   : > { %v1066_v19 = vpop.f32.mrb[8].mxu0 }
 0x2a4   : > { %v700_v20 = vadd.f32 %v1066_v19, %v991_v18  ;;  %v691_v21 = vpop.f32.mrb[9].mxu0 }
 0x2a5   : > { %v692_v22 = vadd.f32 %v991_v18, %v691_v21  ;;  %v1067_v23 = vpop.f32.mrb[10].mxu0 }
 0x2a6   : > { %v703_v24 = vadd.f32 %v1067_v23, %v991_v18  ;;  %v694_v25 = vpop.f32.mrb[11].mxu0  ;;  %v724_v27 = vmax.f32 %v700_v20, 0.0 }
 0x2a7   : > { %v695_v26 = vadd.f32 %v991_v18, %v694_v25  ;;  %v722_v29 = vmax.f32 %v692_v22, 0.0 }
 0x2a8   : > { %v725_v28 = vmax.f32 %v703_v24, 0.0 }
 0x2a9   : > { %v723_v30 = vmax.f32 %v695_v26, 0.0 }
 0x2aa   : > { %v731_v31 = vpack.c.bf16 %v725_v28, %v724_v27 }
 0x2ab   : > { %v730_v32 = vpack.c.bf16 %v723_v30, %v722_v29  ;;  %v1070_v33 = vpop.f32.mrb[12].mxu0 }
 0x2ac   : > { %v716_v34 = vadd.f32 %v1070_v33, %v991_v18  ;;  %v707_v35 = vpop.f32.mrb[13].mxu0 }
 0x2ad   : > { %v708_v36 = vadd.f32 %v991_v18, %v707_v35  ;;  %v1071_v37 = vpop.f32.mrb[14].mxu0  ;;  %1080 = vmatprep.mubr.msk.bf16.mxu1 %vm542_vm2, %v730_v32 }
 0x2ae   : > { %v719_v38 = vadd.f32 %v1071_v37, %v991_v18  ;;  %v710_v39 = vpop.f32.mrb[15].mxu0  ;;  %1081 = vmatmul.mubr.msk.bf16.vlgmr.msra.gmra.mrb[8].mxu1 %vm542_vm2, %v731_v31  ;;  %v728_v41 = vmax.f32 %v716_v34, 0.0 }
 0x2af   : > { %v711_v40 = vadd.f32 %v991_v18, %v710_v39  ;;  %v726_v43 = vmax.f32 %v708_v36, 0.0 }
 0x2b0   : > { %v729_v42 = vmax.f32 %v719_v38, 0.0 }
 0x2b1   : > { %v727_v44 = vmax.f32 %v711_v40, 0.0 }
 0x2b2   : > { %v733_v45 = vpack.c.bf16 %v729_v42, %v728_v41 }
 0x2b3   : > { %v732_v46 = vpack.c.bf16 %v727_v44, %v726_v43 }
 0x2b5   : > { %1084 = vmatprep.mubr.msk.bf16.mxu1 %vm542_vm2, %v732_v46 }
 0x2b6   : > { %1085 = vmatmul.mubr.msk.bf16.gmra.mrb[12].mxu1 %vm542_vm2, %v733_v45 }
 0x381   : > { %v1082_v48 = vpop.f32.mrb[8].mxu1 }
 0x382   : > { %v828_v49 = vadd.f32 %v1082_v48, %v996_v47  ;;  %v819_v50 = vpop.f32.mrb[9].mxu1 }
 0x383   : > { %v820_v51 = vadd.f32 %v996_v47, %v819_v50  ;;  %v1083_v52 = vpop.f32.mrb[10].mxu1 }
 0x384   : > { %v852_v53 = vmax.f32 %v828_v49, 0.0  ;;  %v831_v54 = vadd.f32 %v1083_v52, %v996_v47  ;;  %v822_v55 = vpop.f32.mrb[11].mxu1 }
 0x385   : > { %v850_v56 = vmax.f32 %v820_v51, 0.0  ;;  %v823_v57 = vadd.f32 %v996_v47, %v822_v55 }
 0x386   : > { %860 = vst.msk [vmem:[%s369_s18 + $0x10] sm:$0xff] %vm413_vm0, %v852_v53  ;;  %v853_v58 = vmax.f32 %v831_v54, 0.0 }
 0x387   : > { %858 = vst.msk [vmem:[%s369_s18] sm:$0xff] %vm413_vm0, %v850_v56  ;;  %v851_v59 = vmax.f32 %v823_v57, 0.0 }
 0x388   : > { %861 = vst.msk [vmem:[%s369_s18 + $0x18] sm:$0xff] %vm413_vm0, %v853_v58 }
 0x389   : > { %859 = vst.msk [vmem:[%s369_s18 + $0x8] sm:$0xff] %vm413_vm0, %v851_v59  ;;  %v1086_v60 = vpop.f32.mrb[12].mxu1 }
 0x38a   : > { %v844_v61 = vadd.f32 %v1086_v60, %v996_v47  ;;  %v835_v62 = vpop.f32.mrb[13].mxu1 }
 0x38b   : > { %v836_v63 = vadd.f32 %v996_v47, %v835_v62  ;;  %v1087_v0 = vpop.f32.mrb[14].mxu1 }
 0x38c   : > { %v856_v1 = vmax.f32 %v844_v61, 0.0  ;;  %v847_v2 = vadd.f32 %v1087_v0, %v996_v47  ;;  %v838_v3 = vpop.f32.mrb[15].mxu1 }
 0x38d   : > { %v854_v4 = vmax.f32 %v836_v63, 0.0  ;;  %v839_v5 = vadd.f32 %v996_v47, %v838_v3 }
 0x38e   : > { %864 = vst.msk [vmem:[%s369_s18 + $0x30] sm:$0xff] %vm413_vm0, %v856_v1  ;;  %v857_v6 = vmax.f32 %v847_v2, 0.0 }
 0x38f   : > { %862 = vst.msk [vmem:[%s369_s18 + $0x20] sm:$0xff] %vm413_vm0, %v854_v4  ;;  %v855_v7 = vmax.f32 %v839_v5, 0.0 }
 0x390   : > { %865 = vst.msk [vmem:[%s369_s18 + $0x38] sm:$0xff] %vm413_vm0, %v857_v6 }
 0x391   : > { %863 = vst.msk [vmem:[%s369_s18 + $0x28] sm:$0xff] %vm413_vm0, %v855_v7 }
 0x392 PF: > { %s21_s13 = sadd.s32 1, %s1113_s13  }
 0x393   : > { %p18_p4 = scmp.ge.s32.totalorder %s21_s13, 10  }
 0x395   :  { %20 = sbr.rel (!%p18_p4) target bundleno = 1 (0x1), region = 98 }

</bundles_post_ra>
